<compile_context>
chip_gen: v5e
topology: v5e:2x2
jax: 0.10.0
libtpu: 0.0.40
codegen_flags: <defaults>
</compile_context>

<pallas_src>
import functools

import jax
import jax.numpy as jnp
from jax.experimental import pallas as pl
from jax.experimental.pallas import tpu as pltpu

LANE = 128   # padded hidden / feature width (lane width)
SUB = 16     # row-count padding multiple (bf16 sublane packing)


def _round_up(x, m):
    return (x + m - 1) // m * m


def _pad2d(x, rows, cols, dtype=None):
    r, c = x.shape
    y = jnp.pad(x, ((0, rows - r), (0, cols - c)))
    return y if dtype is None else y.astype(dtype)


def _pad_row(b, width):
    # b: [1, k] -> [width]
    return jnp.pad(b[0], (0, width - b.shape[1]))


def _nbytes(shape, dtype):
    n = 1
    for s in shape:
        n *= int(s)
    return n * jnp.dtype(dtype).itemsize


def _compiler_params(block_bytes):
    # Right-sized VMEM budget: 2x (double buffering) + headroom for in-kernel
    # intermediates, clamped to stay under v7x's 64 MiB physical VMEM.
    limit = int(min(max(2 * block_bytes + (4 << 20), 8 << 20), 60 << 20))
    return pltpu.CompilerParams(dimension_semantics=("parallel",),
                                vmem_limit_bytes=limit)


# ----------------------------------------------------------------------------- kernels
def _encode_kernel(nf_ref, wn_ref, bn_ref, h_ref):
    # h0 = relu(node_features @ Wn + bn), per node tile.
    h = jnp.dot(nf_ref[...], wn_ref[...], preferred_element_type=jnp.float32)
    h_ref[...] = jnp.maximum(h + bn_ref[0:1, :], 0.0)


def _layer_kernel(adj_ref, eagg_ref, h_ref, wagg_ref, wih_ref, whh_ref, b_ref,
                  hout_ref, *, tm):
    # One message-passing + GRUCell layer for one node tile.
    #   adj_ref : [TM, NP]  bf16 streamed row-block of the adjacency (edge counts)
    #   h_ref   : [NP, H]   f32 full node state (resident across tiles)
    #   eagg_ref: [TM, H]   f32 precomputed edge contribution for this tile
    f32, bf16 = jnp.float32, jnp.bfloat16
    hp = LANE
    dot = lambda a, b: jnp.dot(a, b, preferred_element_type=f32)

    i = pl.program_id(0)
    row0 = pl.multiple_of(i * tm, tm)
    h_t = h_ref[pl.ds(row0, tm), :]                                   # [TM, H] f32

    # messages = adj_tile @ h @ Wagg_n + edge_agg_tile
    gathered = dot(adj_ref[...], h_ref[...].astype(bf16))             # [TM, H]
    msgs = dot(gathered.astype(bf16), wagg_ref[...]) + eagg_ref[...]  # [TM, H]

    # torch.nn.GRUCell(input=messages, hidden=h); gates fused (r | z | n).
    gi = dot(msgs.astype(bf16), wih_ref[...]) + b_ref[0:1, :]         # [TM, 3H]
    gh = dot(h_t.astype(bf16), whh_ref[...]) + b_ref[1:2, :]          # [TM, 3H]
    r = jax.nn.sigmoid(gi[:, 0:hp] + gh[:, 0:hp])
    z = jax.nn.sigmoid(gi[:, hp:2 * hp] + gh[:, hp:2 * hp])
    n = jnp.tanh(gi[:, 2 * hp:3 * hp] + r * gh[:, 2 * hp:3 * hp])
    hout_ref[...] = (1.0 - z) * n + z * h_t


def _output_kernel(h_ref, w1_ref, w2_ref, b_ref, prob_ref):
    # Output MLP + sigmoid; lane-dense slab, column 0 carries the probability.
    f32, bf16 = jnp.float32, jnp.bfloat16
    hp = LANE
    dot = lambda a, b: jnp.dot(a, b, preferred_element_type=f32)
    hid = jnp.maximum(dot(h_ref[...].astype(bf16), w1_ref[...]) + b_ref[0:1, 0:hp], 0.0)
    logits = dot(hid.astype(bf16), w2_ref[...]) + b_ref[0:1, hp:2 * hp]
    prob_ref[...] = jax.nn.sigmoid(logits)


# ----------------------------------------------------------------------------- wrapper
def tgn_forward(params, node_features, edge_index, edge_attr, post_mask, n_layers=2):
    f32, bf16 = jnp.float32, jnp.bfloat16
    N, node_dim = node_features.shape
    E, edge_dim = edge_attr.shape
    H = params["wn"].shape[1]
    assert max(node_dim, edge_dim, H, params["w1"].shape[1], params["w2"].shape[1]) <= LANE

    # Node-axis tiling: one tile for small graphs, 256-row tiles for large graphs
    # (>= 256 fills the 256x256 MXU on v6e/v7x; also fine on v5e's 128x128).
    if N <= 256:
        NP = _round_up(N, SUB)
        TM = NP
    else:
        TM = 256
        NP = _round_up(N, TM)
    n_tiles = NP // TM

    src, dst = edge_index[0], edge_index[1]

    # Adjacency (edge counts) via O(E) scatter-add -- no dense one-hot contraction.
    # bf16 is exact for per-(dst, src) multiplicities <= 256.
    adj = jnp.zeros((NP, NP), f32).at[dst, src].add(1.0).astype(bf16)

    # Loop-invariant edge contribution, hoisted out of the kernels (per perf review):
    #   edge_agg[d] = sum_{edges i : dst(i) = d} (relu(ea_i @ We + be) @ Wagg_e + bagg)
    e = jax.nn.relu(edge_attr.astype(f32) @ params["we"] + params["be"])   # [E, H]
    edge_msgs = e @ params["wagg_e"] + params["bagg"]                      # [E, H]
    edge_agg = jnp.zeros((NP, H), f32).at[dst].add(edge_msgs)
    edge_agg = _pad2d(edge_agg, NP, LANE)                                  # [NP, LANE]

    nf = _pad2d(node_features, NP, LANE, bf16)

    # Weights: zero-pad to 128-lane tiles, cast to bf16 (MXU native); biases stay f32.
    wn = _pad2d(params["wn"], LANE, LANE, bf16)
    wagg_n = _pad2d(params["wagg_n"], LANE, LANE, bf16)
    w_ih = jnp.concatenate([_pad2d(params["wir"], LANE, LANE),
                            _pad2d(params["wiz"], LANE, LANE),
                            _pad2d(params["win"], LANE, LANE)], axis=1).astype(bf16)
    w_hh = jnp.concatenate([_pad2d(params["whr"], LANE, LANE),
                            _pad2d(params["whz"], LANE, LANE),
                            _pad2d(params["whn"], LANE, LANE)], axis=1).astype(bf16)
    w1 = _pad2d(params["w1"], LANE, LANE, bf16)
    w2 = _pad2d(params["w2"], LANE, LANE, bf16)

    bn = _pad_row(params["bn"], LANE)[None, :]                             # [1, LANE]
    gru_b = jnp.stack([
        jnp.concatenate([_pad_row(params["bir"], LANE),
                         _pad_row(params["biz"], LANE),
                         _pad_row(params["bin"], LANE)]),
        jnp.concatenate([_pad_row(params["bhr"], LANE),
                         _pad_row(params["bhz"], LANE),
                         _pad_row(params["bhn"], LANE)]),
    ])                                                                     # [2, 3*LANE]
    out_b = jnp.concatenate([_pad_row(params["b1"], LANE),
                             _pad_row(params["b2"], LANE)])[None, :]       # [1, 2*LANE]

    tile_spec = pl.BlockSpec((TM, LANE), lambda i: (i, 0))
    full = lambda shape: pl.BlockSpec(shape, lambda i: (0, 0))

    # ---- node encoder --------------------------------------------------------
    enc_bytes = (_nbytes((TM, LANE), bf16) + _nbytes((LANE, LANE), bf16)
                 + _nbytes((1, LANE), f32) + _nbytes((TM, LANE), f32))
    h = pl.pallas_call(
        _encode_kernel,
        grid=(n_tiles,),
        out_shape=jax.ShapeDtypeStruct((NP, LANE), f32),
        in_specs=[tile_spec, full((LANE, LANE)), full((1, LANE))],
        out_specs=tile_spec,
        compiler_params=_compiler_params(enc_bytes),
    )(nf, wn, bn)

    # ---- message passing + GRU layers ------------------------------------------
    # adj row-blocks are streamed from HBM (the only O(N^2) object); h, edge_agg and
    # the weights stay VMEM-resident. One pallas_call per layer = cross-tile sync,
    # so the node-tile axis is safely "parallel" (megacore on v7x).
    # TODO(synk): on v5e, sweep pipeline_mode=pl.Buffered(3) on the adj spec if the
    # streamed adj DMA is exposed.
    layer_bytes = (_nbytes((TM, NP), bf16) + _nbytes((TM, LANE), f32)
                   + _nbytes((NP, LANE), f32) + _nbytes((LANE, LANE), bf16)
                   + 2 * _nbytes((LANE, 3 * LANE), bf16) + _nbytes((2, 3 * LANE), f32)
                   + _nbytes((TM, LANE), f32) + 6 * _nbytes((TM, 3 * LANE), f32))
    layer_call = pl.pallas_call(
        functools.partial(_layer_kernel, tm=TM),
        grid=(n_tiles,),
        out_shape=jax.ShapeDtypeStruct((NP, LANE), f32),
        in_specs=[
            pl.BlockSpec((TM, NP), lambda i: (i, 0)),      # adj row-block (streamed)
            tile_spec,                                     # edge_agg tile
            full((NP, LANE)),                              # h (full, resident)
            full((LANE, LANE)),                            # wagg_n
            full((LANE, 3 * LANE)),                        # w_ih (r|z|n fused)
            full((LANE, 3 * LANE)),                        # w_hh (r|z|n fused)
            full((2, 3 * LANE)),                           # GRU biases
        ],
        out_specs=tile_spec,
        compiler_params=_compiler_params(layer_bytes),
    )
    for _ in range(n_layers):
        h = layer_call(adj, edge_agg, h, wagg_n, w_ih, w_hh, gru_b)

    # ---- output MLP + sigmoid ----------------------------------------------------
    out_bytes = (2 * _nbytes((TM, LANE), f32) + 2 * _nbytes((LANE, LANE), bf16)
                 + _nbytes((1, 2 * LANE), f32))
    probs = pl.pallas_call(
        _output_kernel,
        grid=(n_tiles,),
        out_shape=jax.ShapeDtypeStruct((NP, LANE), f32),
        in_specs=[tile_spec, full((LANE, LANE)), full((LANE, LANE)),
                  full((1, 2 * LANE))],
        out_specs=tile_spec,
        compiler_params=_compiler_params(out_bytes),
    )(h, w1, w2, out_b)

    # TODO(synk): for very large N, pack 128 node probabilities per lane-dense row
    # instead of a [NP, 128] slab (column 0 used) to cut output write bandwidth.
    return probs[:N, 0][post_mask]


# ----------------------------------------------------------------------------- params
def init_params(key, node_dim, edge_dim, hidden_dim, output_dim):
    def lin(k, fan_in, fan_out):
        kw, kb = jax.random.split(k)
        s = 1.0 / jnp.sqrt(fan_in)
        w = jax.random.uniform(kw, (fan_in, fan_out), jnp.float32, -s, s)
        b = jax.random.uniform(kb, (1, fan_out), jnp.float32, -s, s)
        return w, b

    keys = jax.random.split(key, 12)
    H = hidden_dim
    p = {}
    p["wn"], p["bn"] = lin(keys[0], node_dim, H)
    p["we"], p["be"] = lin(keys[1], edge_dim, H)
    # message_aggregator: Linear(2H -> H) split into node-part and edge-part
    p["wagg_n"], p["bagg"] = lin(keys[2], H, H)
    p["wagg_e"], _ = lin(keys[3], H, H)
    # GRUCell gates
    p["wir"], p["bir"] = lin(keys[4], H, H)
    p["wiz"], p["biz"] = lin(keys[5], H, H)
    p["win"], p["bin"] = lin(keys[6], H, H)
    p["whr"], p["bhr"] = lin(keys[7], H, H)
    p["whz"], p["bhz"] = lin(keys[8], H, H)
    p["whn"], p["bhn"] = lin(keys[9], H, H)
    # output MLP
    p["w1"], p["b1"] = lin(keys[10], H, H // 2)
    p["w2"], p["b2"] = lin(keys[11], H // 2, output_dim)
    return p


# ----------------------------------------------------------------------------- reference
def tgn_reference(params, node_features, edge_index, edge_attr, post_mask, n_layers=2):
    N = node_features.shape[0]
    src, dst = edge_index[0], edge_index[1]
    src_oh = jax.nn.one_hot(src, N, dtype=jnp.float32)
    dst_oh = jax.nn.one_hot(dst, N, dtype=jnp.float32).T
    h = jax.nn.relu(node_features @ params["wn"] + params["bn"])
    e = jax.nn.relu(edge_attr @ params["we"] + params["be"])
    for _ in range(n_layers):
        gathered = src_oh @ h
        msgs = gathered @ params["wagg_n"] + e @ params["wagg_e"] + params["bagg"]
        m = dst_oh @ msgs
        r = jax.nn.sigmoid(m @ params["wir"] + params["bir"] + h @ params["whr"] + params["bhr"])
        z = jax.nn.sigmoid(m @ params["wiz"] + params["biz"] + h @ params["whz"] + params["bhz"])
        n = jnp.tanh(m @ params["win"] + params["bin"] + r * (h @ params["whn"] + params["bhn"]))
        h = (1.0 - z) * n + z * h
    hid = jax.nn.relu(h @ params["w1"] + params["b1"])
    logits = (hid @ params["w2"] + params["b2"])[:, 0]
    return jax.nn.sigmoid(logits)[post_mask]


# ----------------------------------------------------------------------------- main
if __name__ == "__main__":
    NODE_DIM, EDGE_DIM, HIDDEN, OUT = 16, 8, 32, 1
    N_NODES, N_EDGES = 16, 24

    key = jax.random.PRNGKey(0)
    k_param, k_nf, k_ea, k_src, k_dst = jax.random.split(key, 5)

    params = init_params(k_param, NODE_DIM, EDGE_DIM, HIDDEN, OUT)

    node_features = jax.random.normal(k_nf, (N_NODES, NODE_DIM), jnp.float32)
    edge_attr = jax.random.normal(k_ea, (N_EDGES, EDGE_DIM), jnp.float32)
    edge_index = jnp.stack([
        jax.random.randint(k_src, (N_EDGES,), 0, N_NODES),
        jax.random.randint(k_dst, (N_EDGES,), 0, N_NODES),
    ])
    post_mask = (jnp.arange(N_NODES) % 3) == 0   # boolean mask over nodes

    probs = tgn_forward(params, node_features, edge_index, edge_attr, post_mask, n_layers=2)
    probs = jax.block_until_ready(probs)

    ref = tgn_reference(params, node_features, edge_index, edge_attr, post_mask, n_layers=2)
    assert probs.shape == ref.shape
    assert bool(jnp.all(jnp.isfinite(probs)))
    assert bool(jnp.allclose(probs, ref, atol=5e-2, rtol=5e-2))

    print("KERNEL_OK")
</pallas_src>

<mosaic_0001>
module attributes {stable_mosaic.version = 11 : i64} {
  func.func @_encode_kernel(%arg0: i32, %arg1: memref<16x128xbf16, #tpu.memory_space<vmem>>, %arg2: memref<128x128xbf16, #tpu.memory_space<vmem>>, %arg3: memref<1x128xf32, #tpu.memory_space<vmem>>, %arg4: memref<16x128xf32, #tpu.memory_space<vmem>>) attributes {dimension_semantics = [#tpu.dimension_semantics<parallel>], iteration_bounds = array<i64: 1>, scalar_prefetch = 0 : i64, scratch_operands = 0 : i64, tpu.core_type = #tpu.core_type<tc>, window_params = [{transform_indices = @transform_0, window_bounds = array<i64: 16, 128>}, {pipeline_mode = #tpu.pipeline_mode<synchronous>, transform_indices = @transform_1, window_bounds = array<i64: 128, 128>}, {pipeline_mode = #tpu.pipeline_mode<synchronous>, transform_indices = @transform_2, window_bounds = array<i64: 1, 128>}, {transform_indices = @transform_3, window_bounds = array<i64: 16, 128>}]} {
    %c0 = arith.constant 0 : index
    %c0_0 = arith.constant 0 : index
    %0 = vector.load %arg1[%c0, %c0_0] : memref<16x128xbf16, #tpu.memory_space<vmem>>, vector<16x128xbf16>
    %c0_1 = arith.constant 0 : index
    %c0_2 = arith.constant 0 : index
    %1 = vector.load %arg2[%c0_1, %c0_2] : memref<128x128xbf16, #tpu.memory_space<vmem>>, vector<128x128xbf16>
    %cst = arith.constant dense<0.000000e+00> : vector<16x128xf32>
    %2 = tpu.matmul %0, %1, %cst {dimension_numbers = #tpu.dot_dimension_numbers<[1], [0], [0], [1], [0, 0, 1, 1], [], []>} : vector<16x128xbf16>, vector<128x128xbf16>, vector<16x128xf32> -> vector<16x128xf32>
    %c0_3 = arith.constant 0 : index
    %c0_4 = arith.constant 0 : index
    %3 = vector.load %arg3[%c0_3, %c0_4] : memref<1x128xf32, #tpu.memory_space<vmem>>, vector<1x128xf32>
    %4 = vector.broadcast %3 : vector<1x128xf32> to vector<16x128xf32>
    %5 = arith.addf %2, %4 : vector<16x128xf32>
    %cst_5 = arith.constant 0.000000e+00 : f32
    %6 = vector.broadcast %cst_5 : f32 to vector<16x128xf32>
    %7 = arith.maximumf %5, %6 : vector<16x128xf32>
    %c0_6 = arith.constant 0 : index
    %c0_7 = arith.constant 0 : index
    %8 = vector.load %arg4[%c0_6, %c0_7] : memref<16x128xf32, #tpu.memory_space<vmem>>, vector<16x128xf32>
    tpu.vector_store %arg4[%c0_6, %c0_7], %7 {strides = array<i32>} : memref<16x128xf32, #tpu.memory_space<vmem>>, vector<16x128xf32>,
    return
  }
  func.func @transform_0(%arg0: i32) -> (i32, i32) {
    %c0_i32 = arith.constant 0 : i32
    %c0_i32_0 = arith.constant 0 : i32
    return %arg0, %c0_i32 : i32, i32
  }
  func.func @transform_1(%arg0: i32) -> (i32, i32) {
    %c0_i32 = arith.constant 0 : i32
    %c0_i32_0 = arith.constant 0 : i32
    %c0_i32_1 = arith.constant 0 : i32
    return %c0_i32, %c0_i32_0 : i32, i32
  }
  func.func @transform_2(%arg0: i32) -> (i32, i32) {
    %c0_i32 = arith.constant 0 : i32
    %c0_i32_0 = arith.constant 0 : i32
    %c0_i32_1 = arith.constant 0 : i32
    return %c0_i32, %c0_i32_0 : i32, i32
  }
  func.func @transform_3(%arg0: i32) -> (i32, i32) {
    %c0_i32 = arith.constant 0 : i32
    %c0_i32_0 = arith.constant 0 : i32
    return %arg0, %c0_i32 : i32, i32
  }
}

</mosaic_0001>

<bundles_post_ra>
// kernel: tpu_custom_call.1
= control target key start
LH: loop header
LB: loop body
LE: loop exit
PB: predicated region body
PF: predicated region fallthrough
CT: control target
= control target key end

     0   :  { %8 = vsyncpa [#allocation3], 0  ;;  %s331_s0 = inlined_call_operand.hbm [shape: bf16[16,128], index: 0, kind: input, shape index: {}]   ;;  %s332_s1 = inlined_call_operand.hbm [shape: bf16[128,128], index: 1, kind: input, shape index: {}]   ;;  %s333_s2 = inlined_call_operand.vmem [shape: f32[1,128], index: 2, kind: input, shape index: {}]   ;;  %s334_s3 = inlined_call_operand.hbm [shape: f32[16,128], index: 3, kind: output, shape index: {}]  }
   0x1   :  { %9 = vsyncpa [#allocation6], 0 }
   0x2   :  { %10 = vsyncpa [#allocation4], 0  ;;  %s15_s14 = sshll.u32 %s331_s0, 4  ;;  %s292_s15 = smov [#allocation2]   ;;  %s16_s14 = int_to_ptr.hbm [resolvable:$true] %s15_s14 }
   0x3   :  { %s17_s16 = sshll.u32 %s292_s15, 4  ;;  %s28_s19 = sshll.u32 %s332_s1, 4  ;;  %s18_s16 = int_to_ptr.vmem [resolvable:$true] %s17_s16  ;;  %s29_s19 = int_to_ptr.hbm [resolvable:$true] %s28_s19 }
   0x4   :  { %s293_s20 = smov 64   ;;  %s294_s21 = smov 4  }
   0x5   :  { %23 = dma.hbm_to_vmem [thread:$0]  %s16_s14, 128, %s18_s16, [#allocation3], %s293_s20, %s293_s20, %s294_s21  }
   0x6   :  { %s295_s22 = smov [#allocation5]  }
   0x7   :  { %s30_s23 = sshll.u32 %s295_s22, 4  ;;  %s31_s23 = int_to_ptr.vmem [resolvable:$true] %s30_s23 }
   0x8   :  { %36 = dma.hbm_to_vmem [thread:$0]  %s29_s19, 1024, %s31_s23, [#allocation6], %s293_s20, %s293_s20, %s294_s21  }
   0x9   :  { %286 = dma.done.wait [#allocation3], 128  }
   0xa   :  { %287 = vsyncadd [#allocation3], 4294967168 }
   0xb   :  { %288 = dma.done.wait [#allocation6], 1024  }
   0xc   :  { %289 = vsyncadd [#allocation6], 4294966272  ;;  %v205_v0 = vld [vmem:[#allocation5 + $0x38] sm:$0xff]  ;;  %v204_v1 = vld [vmem:[#allocation5 + $0x30] sm:$0xff]  ;;  %s296_s24 = smov [#allocation7]   ;;  %s147_s28 = sshll.u32 %s334_s3, 4  ;;  %s148_s28 = int_to_ptr.hbm [resolvable:$true] %s147_s28 }
   0xd   :  { %123 = vmatpush.bf16.msra.mxu0 %v205_v0  ;;  %v203_v2 = vld [vmem:[#allocation5 + $0x28] sm:$0xff]  ;;  %v202_v3 = vld [vmem:[#allocation5 + $0x20] sm:$0xff]  ;;  %v201_v4 = vld [vmem:[#allocation5 + $0x18] sm:$0xff]  ;;  %s145_s25 = sshll.u32 %s296_s24, 4  ;;  %s297_s29 = smov 128   ;;  %s146_s25 = int_to_ptr.vmem [resolvable:$true] %s145_s25 }
   0xe   :  { %v200_v5 = vld [vmem:[#allocation5 + $0x10] sm:$0xff]  ;;  %v199_v6 = vld [vmem:[#allocation5 + $0x8] sm:$0xff]  ;;  %v198_v7 = vld [vmem:[#allocation5] sm:$0xff]  ;;  %s298_s30 = smov 8  }
   0xf   :  { %v197_v8 = vld [vmem:[#allocation2] sm:$0xff] }
  0x10   :  { %v213_v9 = vld [vmem:[%s333_s2] ss:$0 sm:$0xff] }
  0x11   :  { %124 = vmatpush.bf16.msra.mxu0 %v204_v1 }
  0x15   :  { %125 = vmatpush.bf16.msra.mxu0 %v203_v2 }
  0x19   :  { %126 = vmatpush.bf16.msra.mxu0 %v202_v3 }
  0x1d   :  { %127 = vmatpush.bf16.msra.mxu0 %v201_v4 }
  0x21   :  { %128 = vmatpush.bf16.msra.mxu0 %v200_v5 }
  0x25   :  { %129 = vmatpush.bf16.msra.mxu0 %v199_v6 }
  0x29   :  { %130 = vmatpush.bf16.msra.mxu0 %v198_v7 }
  0x2c   :  { %131 = vmatmul.bf16.vlgmr.msra.gmra.mxu0 %v197_v8 }
  0xa9   :  { %v132_v10 = vpop.f32.mrf.mxu0 }
  0xaa   :  { %v133_v11 = vadd.f32 %v213_v9, %v132_v10 }
  0xac   :  { %v137_v12 = vmax.f32 %v133_v11, 0.0 }
  0xae   :  { %139 = vst [vmem:[#allocation7] sm:$0xff] %v137_v12 }
  0xb1   :  { %v134_v13 = vpop.f32.mrf.mxu0 }
  0xb2   :  { %v135_v14 = vadd.f32 %v213_v9, %v134_v13 }
  0xb4   :  { %v138_v15 = vmax.f32 %v135_v14, 0.0 }
  0xb6   :  { %140 = vst [vmem:[#allocation7 + $0x8] sm:$0xff] %v138_v15 }
  0xb7   :  { %153 = dma.vmem_to_hbm [thread:$0]  %s146_s25, 256, %s148_s28, [#allocation4], %s297_s29, %s297_s29, %s298_s30  }
  0xb8   :  { %290 = dma.done.wait [#allocation4], 256  }
  0xb9   :  { %291 = vsyncadd [#allocation4], 4294967040 }
  0xba   :  { %158 = vsyncpa [#allocation3], 1 }
  0xbb   :  { %159 = vsyncpa [#allocation6], 1 }
  0xbc   :  { %160 = vsyncpa [#allocation4], 1 }

</bundles_post_ra>
